<compile_context>
chip_gen: v5e
topology: v5e:2x2
jax: 0.10.0
libtpu: 0.0.40
codegen_flags: <defaults>
</compile_context>

<pallas_src>
import math

import jax
import jax.numpy as jnp
from jax import lax
from jax.experimental import pallas as pl
from jax.experimental.pallas import tpu as pltpu

KSIZE = 7
PAD = (KSIZE - 1) // 2  # 3
VMEM_LIMIT = 32 * 1024 * 1024          # explicit scoped-VMEM limit (all gens)
TILE_BUDGET = 4 << 20                  # per-buffer tile budget (bytes)
MIN_TILE = 1 << 20                     # don't split spatially below ~1 MiB tiles


def _pick_tiles(C, L, itemsize=4):
    """Pick (channel_tile ck, spatial_tile tl) for the streaming passes.

    tl: multiple-of-128 divisor of L (or full L).  Split only when it creates a
        second parallel grid axis without dropping tiles under ~1 MiB, or when
        needed to fit the budget.
    ck: largest multiple-of-8 (or full-C) divisor of C with ck*tl*itemsize under
        the per-buffer budget (sized so 2x-buffered in+out tiles stay well under
        v7x's 64 MiB VMEM).
    """
    tl = L
    if L % 128 == 0:
        for parts in (2, 4, 8):
            cand = L // parts
            if L % parts == 0 and cand % 128 == 0 and C * cand * itemsize >= MIN_TILE:
                tl = cand
                break
        # If even an 8-channel slice of a full row overflows the budget, shrink tl.
        if 8 * tl * itemsize > TILE_BUDGET:
            best = 128
            d = 128
            while d <= L:
                if L % d == 0 and 8 * d * itemsize <= TILE_BUDGET:
                    best = d
                d += 128
            tl = best

    max_ck = max(1, TILE_BUDGET // (tl * itemsize))
    if C <= max_ck:
        ck = C
    else:
        ck = None
        d = 8
        while d < C:
            if C % d == 0 and d <= max_ck:
                ck = d
            d += 8
        if ck is None:
            # No multiple-of-8 divisor fits; fall back to smallest one (or full C).
            d = 8
            while d < C:
                if C % d == 0:
                    ck = d
                    break
                d += 8
            if ck is None:
                ck = C
    return ck, tl


def _make_pool_kernel(C):
    """Stage 1: lane-dense channel max/mean pooling with running accumulators."""
    inv_c = 1.0 / float(C)

    def kernel(x_ref, o_ref, mx_ref, sm_ref):
        # x_ref : VMEM (1, ck, tl)
        # o_ref : VMEM (1, 2, tl) f32   row 0 = channel max, row 1 = channel mean
        # mx_ref, sm_ref : VMEM (1, tl) f32 running max / running sum
        k = pl.program_id(2)
        blk = x_ref[0].astype(jnp.float32)              # (ck, tl)
        bmax = jnp.max(blk, axis=0, keepdims=True)      # (1, tl)
        bsum = jnp.sum(blk, axis=0, keepdims=True)      # (1, tl)

        @pl.when(k == 0)
        def _():
            mx_ref[...] = bmax
            sm_ref[...] = bsum

        @pl.when(k > 0)
        def _():
            mx_ref[...] = jnp.maximum(mx_ref[...], bmax)
            sm_ref[...] = sm_ref[...] + bsum

        @pl.when(k == pl.num_programs(2) - 1)
        def _():
            o_ref[0, 0:1, :] = mx_ref[...]
            o_ref[0, 1:2, :] = sm_ref[...] * inv_c

    return kernel


def _make_conv_kernel(H, W):
    """Stage 2: 7x7 'same' conv on the 2 pooled planes via pre-shifted planes."""

    def kernel(w_ref, p_ref, o_ref, shmax_ref, shmean_ref):
        # w_ref   : SMEM (2*7*7,) f32  flattened conv weight [in_ch, ky, kx]
        # p_ref   : VMEM (1, 2, H, W)  pooled planes (0 = max, 1 = mean)
        # o_ref   : VMEM (1, H, W) f32 raw conv output (pre-BN)
        # sh*_ref : VMEM (7, H+6, W) f32 pre-shifted zero-padded planes (scratch)
        shmax_ref[...] = jnp.zeros_like(shmax_ref)
        shmean_ref[...] = jnp.zeros_like(shmean_ref)
        mx = p_ref[0, 0]                                 # (H, W)
        mn = p_ref[0, 1]                                 # (H, W)

        # Build the 7 column-shifted copies of each padded plane once:
        # sh[kx][r, j] = padded_plane[r, j + kx].  ~14 lane shifts total instead
        # of ~98 unaligned reads inside the tap loop.
        for kx in range(KSIZE):
            s = kx - PAD
            lo = max(0, -s)
            hi = min(W, W - s)
            if hi <= lo:
                continue
            shmax_ref[kx, PAD:PAD + H, lo:hi] = mx[:, lo + s:hi + s]
            shmean_ref[kx, PAD:PAD + H, lo:hi] = mn[:, lo + s:hi + s]

        # 49 taps x 2 channels: lane-aligned reads varying only in ky (sublane).
        # TODO(synk): for very large H*W, tile the accumulator into row bands to
        # stay within the 64-vreg budget instead of one (H, W) register array.
        acc = jnp.zeros((H, W), jnp.float32)
        for ky in range(KSIZE):
            for kx in range(KSIZE):
                wm = w_ref[ky * KSIZE + kx]                     # max-channel tap
                wa = w_ref[KSIZE * KSIZE + ky * KSIZE + kx]     # mean-channel tap
                acc = acc + wm * shmax_ref[kx, ky:ky + H, :]
                acc = acc + wa * shmean_ref[kx, ky:ky + H, :]
        o_ref[0] = acc

    return kernel


def _gate_mul_kernel(g_ref, x_ref, o_ref):
    """Stage 3: pure broadcast multiply x * gate (gate precomputed per batch)."""
    # g_ref : VMEM (1, 1, tl) f32 sigmoid gate plane
    # x_ref : VMEM (1, ck, tl)
    # o_ref : VMEM (1, ck, tl)
    xf = x_ref[...].astype(jnp.float32)
    o_ref[...] = (xf * g_ref[...]).astype(o_ref.dtype)


def spatial_attention_pallas(x, conv_w, gamma=1.0, beta=0.0, eps=1e-5):
    """x: (B, C, H, W) float (NCHW). conv_w: (1, 2, 7, 7)."""
    B, C, H, W = x.shape
    L = H * W
    ck, tl = _pick_tiles(C, L, itemsize=4)
    nl = L // tl
    nk = C // ck

    w_flat = jnp.asarray(conv_w, jnp.float32).reshape(-1)       # (2*7*7,)
    x_flat = x.reshape(B, C, L)

    # ---- Stage 1: lane-dense channel max/mean pooling (tiled over C and L). ----
    pooled = pl.pallas_call(
        _make_pool_kernel(C),
        out_shape=jax.ShapeDtypeStruct((B, 2, L), jnp.float32),
        grid=(B, nl, nk),
        in_specs=[
            pl.BlockSpec((1, ck, tl), lambda b, l, k: (b, k, l)),
        ],
        out_specs=pl.BlockSpec((1, 2, tl), lambda b, l, k: (b, 0, l)),
        scratch_shapes=[
            pltpu.VMEM((1, tl), jnp.float32),
            pltpu.VMEM((1, tl), jnp.float32),
        ],
        compiler_params=pltpu.CompilerParams(
            dimension_semantics=("parallel", "parallel", "arbitrary"),
            vmem_limit_bytes=VMEM_LIMIT),
    )(x_flat)

    # ---- Stage 2: 7x7 'same' conv on the tiny pooled planes, grid over batch. ----
    # TODO(synk): for B=1 on v7x, split H into row bands (3-row halo) for a
    # second parallel axis; the conv is tiny so it is left per-batch here.
    pooled_hw = pooled.reshape(B, 2, H, W)
    conv_out = pl.pallas_call(
        _make_conv_kernel(H, W),
        out_shape=jax.ShapeDtypeStruct((B, H, W), jnp.float32),
        grid=(B,),
        in_specs=[
            pl.BlockSpec(memory_space=pltpu.MemorySpace.SMEM),          # weights
            pl.BlockSpec((1, 2, H, W), lambda b: (b, 0, 0, 0)),         # pooled
        ],
        out_specs=pl.BlockSpec((1, H, W), lambda b: (b, 0, 0)),
        scratch_shapes=[
            pltpu.VMEM((KSIZE, H + 2 * PAD, W), jnp.float32),
            pltpu.VMEM((KSIZE, H + 2 * PAD, W), jnp.float32),
        ],
        compiler_params=pltpu.CompilerParams(
            dimension_semantics=("parallel",),
            vmem_limit_bytes=VMEM_LIMIT),
    )(w_flat, pooled_hw)

    # ---- Training-mode BatchNorm2d(1) stats + sigmoid gate, once per batch. ----
    # conv_out is only B*H*W floats; the global mean/var reduction needs a sync
    # point anyway, so fold BN + sigmoid here and keep stage 3 a pure multiply.
    mean = jnp.mean(conv_out)
    var = jnp.mean(jnp.square(conv_out - mean))                  # biased batch var
    scale = gamma * lax.rsqrt(var + eps)
    shift = beta - mean * scale
    gate_flat = jax.nn.sigmoid(conv_out * scale + shift).reshape(B, 1, L)
    gate_flat = gate_flat.astype(jnp.float32)

    # ---- Stage 3: gating multiply, lane-dense, blocked & pipelined. ----
    out_flat = pl.pallas_call(
        _gate_mul_kernel,
        out_shape=jax.ShapeDtypeStruct((B, C, L), x.dtype),
        grid=(B, nl, nk),
        in_specs=[
            pl.BlockSpec((1, 1, tl), lambda b, l, c: (b, 0, l)),        # gate plane
            pl.BlockSpec((1, ck, tl), lambda b, l, c: (b, c, l)),       # x tile
        ],
        out_specs=pl.BlockSpec((1, ck, tl), lambda b, l, c: (b, c, l)),
        compiler_params=pltpu.CompilerParams(
            dimension_semantics=("parallel", "parallel", "parallel"),
            vmem_limit_bytes=VMEM_LIMIT),
    )(gate_flat, x_flat)
    return out_flat.reshape(B, C, H, W)


def spatial_attention_reference(x, conv_w, gamma=1.0, beta=0.0, eps=1e-5):
    """Pure-JAX reference matching the PyTorch module forward (training-mode BN)."""
    mx = jnp.max(x, axis=1, keepdims=True)
    mn = jnp.mean(x, axis=1, keepdims=True)
    comp = jnp.concatenate([mx, mn], axis=1)                     # (B, 2, H, W)
    y = lax.conv_general_dilated(
        comp, conv_w, window_strides=(1, 1), padding=((PAD, PAD), (PAD, PAD)),
        dimension_numbers=("NCHW", "OIHW", "NCHW"),
        precision=jax.lax.Precision.HIGHEST)                     # (B, 1, H, W)
    mean = jnp.mean(y)
    var = jnp.mean(jnp.square(y - mean))                         # biased batch var
    y_hat = (y - mean) / jnp.sqrt(var + eps) * gamma + beta
    return x * jax.nn.sigmoid(y_hat)


if __name__ == "__main__":
    key = jax.random.PRNGKey(0)
    kx_key, kw_key = jax.random.split(key)

    B, C, H, W = 2, 4, 16, 16
    x = jax.random.normal(kx_key, (B, C, H, W), jnp.float32)

    # Deterministic conv weight init (PyTorch-style kaiming_uniform bound).
    fan_in = 2 * KSIZE * KSIZE
    bound = 1.0 / math.sqrt(fan_in)
    conv_w = jax.random.uniform(kw_key, (1, 2, KSIZE, KSIZE), jnp.float32,
                                minval=-bound, maxval=bound)
    gamma, beta, eps = 1.0, 0.0, 1e-5

    out = spatial_attention_pallas(x, conv_w, gamma, beta, eps)
    out = jax.block_until_ready(out)

    ref = spatial_attention_reference(x, conv_w, gamma, beta, eps)
    assert out.shape == x.shape and out.dtype == x.dtype
    max_err = float(jnp.max(jnp.abs(out - ref)))
    assert max_err < 2e-2, f"max abs error vs reference too large: {max_err}"

    print("KERNEL_OK")
</pallas_src>

<mosaic_0001>
module attributes {stable_mosaic.version = 11 : i64} {
  func.func @kernel(%arg0: i32, %arg1: i32, %arg2: i32, %arg3: memref<1x4x256xf32, #tpu.memory_space<vmem>>, %arg4: memref<1x2x256xf32, #tpu.memory_space<vmem>>, %arg5: memref<1x256xf32, #tpu.memory_space<vmem>>, %arg6: memref<1x256xf32, #tpu.memory_space<vmem>>) attributes {dimension_semantics = [#tpu.dimension_semantics<parallel>, #tpu.dimension_semantics<parallel>, #tpu.dimension_semantics<arbitrary>], iteration_bounds = array<i64: 2, 1, 1>, scalar_prefetch = 0 : i64, scratch_operands = 2 : i64, tpu.core_type = #tpu.core_type<tc>, window_params = [{transform_indices = @transform_0, window_bounds = array<i64: 1, 4, 256>}, {transform_indices = @transform_1, window_bounds = array<i64: 1, 2, 256>}]} {
    %c0 = arith.constant 0 : index
    %c0_0 = arith.constant 0 : index
    %c0_1 = arith.constant 0 : index
    %0 = vector.load %arg3[%c0, %c0_0, %c0_1] : memref<1x4x256xf32, #tpu.memory_space<vmem>>, vector<1x4x256xf32>
    %1 = vector.shape_cast %0 : vector<1x4x256xf32> to vector<4x256xf32>
    %cst = arith.constant dense<0xFF800000> : vector<256xf32>
    %2 = vector.multi_reduction <maximumf>, %1, %cst [0] : vector<4x256xf32> to vector<256xf32>
    %3 = vector.shape_cast %2 : vector<256xf32> to vector<1x256xf32>
    %cst_2 = arith.constant dense<0.000000e+00> : vector<256xf32>
    %4 = vector.multi_reduction <add>, %1, %cst_2 [0] : vector<4x256xf32> to vector<256xf32>
    %5 = vector.shape_cast %4 : vector<256xf32> to vector<1x256xf32>
    %c0_i32 = arith.constant 0 : i32
    %6 = arith.cmpi eq, %arg2, %c0_i32 : i32
    %7 = arith.extui %6 : i1 to i32
    %c0_i32_3 = arith.constant 0 : i32
    %8 = arith.cmpi ne, %7, %c0_i32_3 : i32
    scf.if %8 {
      %c0_8 = arith.constant 0 : index
      %c0_9 = arith.constant 0 : index
      %15 = vector.load %arg5[%c0_8, %c0_9] : memref<1x256xf32, #tpu.memory_space<vmem>>, vector<1x256xf32>
      tpu.vector_store %arg5[%c0_8, %c0_9], %3 {strides = array<i32>} : memref<1x256xf32, #tpu.memory_space<vmem>>, vector<1x256xf32>,
      %c0_10 = arith.constant 0 : index
      %c0_11 = arith.constant 0 : index
      %16 = vector.load %arg6[%c0_10, %c0_11] : memref<1x256xf32, #tpu.memory_space<vmem>>, vector<1x256xf32>
      tpu.vector_store %arg6[%c0_10, %c0_11], %5 {strides = array<i32>} : memref<1x256xf32, #tpu.memory_space<vmem>>, vector<1x256xf32>,
    } else {
    }
    %c0_i32_4 = arith.constant 0 : i32
    %9 = arith.cmpi sgt, %arg2, %c0_i32_4 : i32
    %10 = arith.extui %9 : i1 to i32
    %c0_i32_5 = arith.constant 0 : i32
    %11 = arith.cmpi ne, %10, %c0_i32_5 : i32
    scf.if %11 {
      %c0_8 = arith.constant 0 : index
      %c0_9 = arith.constant 0 : index
      %15 = vector.load %arg5[%c0_8, %c0_9] : memref<1x256xf32, #tpu.memory_space<vmem>>, vector<1x256xf32>
      %16 = arith.maximumf %15, %3 : vector<1x256xf32>
      %c0_10 = arith.constant 0 : index
      %c0_11 = arith.constant 0 : index
      %17 = vector.load %arg5[%c0_10, %c0_11] : memref<1x256xf32, #tpu.memory_space<vmem>>, vector<1x256xf32>
      tpu.vector_store %arg5[%c0_10, %c0_11], %16 {strides = array<i32>} : memref<1x256xf32, #tpu.memory_space<vmem>>, vector<1x256xf32>,
      %c0_12 = arith.constant 0 : index
      %c0_13 = arith.constant 0 : index
      %18 = vector.load %arg6[%c0_12, %c0_13] : memref<1x256xf32, #tpu.memory_space<vmem>>, vector<1x256xf32>
      %19 = arith.addf %18, %5 : vector<1x256xf32>
      %c0_14 = arith.constant 0 : index
      %c0_15 = arith.constant 0 : index
      %20 = vector.load %arg6[%c0_14, %c0_15] : memref<1x256xf32, #tpu.memory_space<vmem>>, vector<1x256xf32>
      tpu.vector_store %arg6[%c0_14, %c0_15], %19 {strides = array<i32>} : memref<1x256xf32, #tpu.memory_space<vmem>>, vector<1x256xf32>,
    } else {
    }
    %c0_i32_6 = arith.constant 0 : i32
    %12 = arith.cmpi eq, %arg2, %c0_i32_6 : i32
    %13 = arith.extui %12 : i1 to i32
    %c0_i32_7 = arith.constant 0 : i32
    %14 = arith.cmpi ne, %13, %c0_i32_7 : i32
    scf.if %14 {
      %c0_8 = arith.constant 0 : index
      %c0_9 = arith.constant 0 : index
      %15 = vector.load %arg5[%c0_8, %c0_9] : memref<1x256xf32, #tpu.memory_space<vmem>>, vector<1x256xf32>
      %c0_10 = arith.constant 0 : index
      %c0_11 = arith.constant 0 : index
      %c0_12 = arith.constant 0 : index
      %16 = vector.load %arg4[%c0_10, %c0_11, %c0_12] : memref<1x2x256xf32, #tpu.memory_space<vmem>>, vector<1x1x256xf32>
      %17 = vector.shape_cast %16 : vector<1x1x256xf32> to vector<1x256xf32>
      %18 = vector.shape_cast %15 : vector<1x256xf32> to vector<1x1x256xf32>
      tpu.vector_store %arg4[%c0_10, %c0_11, %c0_12], %18 {strides = array<i32>} : memref<1x2x256xf32, #tpu.memory_space<vmem>>, vector<1x1x256xf32>,
      %c0_13 = arith.constant 0 : index
      %c0_14 = arith.constant 0 : index
      %19 = vector.load %arg6[%c0_13, %c0_14] : memref<1x256xf32, #tpu.memory_space<vmem>>, vector<1x256xf32>
      %cst_15 = arith.constant 2.500000e-01 : f32
      %20 = vector.broadcast %cst_15 : f32 to vector<1x256xf32>
      %21 = arith.mulf %19, %20 : vector<1x256xf32>
      %c0_16 = arith.constant 0 : index
      %c1 = arith.constant 1 : index
      %c0_17 = arith.constant 0 : index
      %22 = vector.load %arg4[%c0_16, %c1, %c0_17] : memref<1x2x256xf32, #tpu.memory_space<vmem>>, vector<1x1x256xf32>
      %23 = vector.shape_cast %22 : vector<1x1x256xf32> to vector<1x256xf32>
      %24 = vector.shape_cast %21 : vector<1x256xf32> to vector<1x1x256xf32>
      tpu.vector_store %arg4[%c0_16, %c1, %c0_17], %24 {strides = array<i32>} : memref<1x2x256xf32, #tpu.memory_space<vmem>>, vector<1x1x256xf32>,
    } else {
    }
    return
  }
  func.func @transform_0(%arg0: i32, %arg1: i32, %arg2: i32) -> (i32, i32, i32) {
    %c0_i32 = arith.constant 0 : i32
    return %arg0, %arg2, %arg1 : i32, i32, i32
  }
  func.func @transform_1(%arg0: i32, %arg1: i32, %arg2: i32) -> (i32, i32, i32) {
    %c0_i32 = arith.constant 0 : i32
    %c0_i32_0 = arith.constant 0 : i32
    return %arg0, %c0_i32, %arg1 : i32, i32, i32
  }
}

</mosaic_0001>

<bundles_post_ra>
// kernel: tpu_custom_call.1
= control target key start
LH: loop header
LB: loop body
LE: loop exit
PB: predicated region body
PF: predicated region fallthrough
CT: control target
= control target key end

     0   :  { %6 = vsyncpa [#allocation5], 0  ;;  %s717_s0 = inlined_call_operand.hbm [shape: f32[2,4,256], index: 0, kind: input, shape index: {}]   ;;  %s718_s1 = inlined_call_operand.hbm [shape: f32[2,2,256], index: 1, kind: output, shape index: {}]  }
   0x1   :  { %8 = vsyncpa [#allocation5 + $0x1], 0 }
   0x2   :  { %9 = vsyncpa [#allocation6], 0 }
   0x3   :  { %11 = vsyncpa [#allocation6 + $0x1], 0  ;;  %s578_s6 = smov 0   ;;  %s580_s7 = smov 0  }
   0x4   :  { %s582_s8 = smov 0   ;;  %s584_s9 = smov 0  }
   0x5   :  { %s586_s10 = smov 0   ;;  %s588_s11 = smov 0  }
   0x6 LB: > { %s374_s12 = sadd.s32 4294967295, %s566_s11   ;;  %s375_s13 = sadd.s32 4294967294, %s566_s11   ;;  %s566_s11 = sphi %s588_s11, %s17_s11   ;;  %s562_s10 = sphi %s586_s10, %s729_s10   ;;  %s558_s9 = sphi %s584_s9, %s728_s9   ;;  %s554_s8 = sphi %s582_s8, %s727_s8   ;;  %s550_s7 = sphi %s580_s7, %s726_s7   ;;  %s546_s6 = sphi %s578_s6, %s725_s6  }
   0x7   : > { %s36_s14 = sadd.s32 1, %s562_s10  ;;  %s47_s15 = sadd.s32 1, %s554_s8 }
   0x8   : > { %p38_p0 = scmp.ge.s32.totalorder %s36_s14, 2  ;;  %p54_p1 = scmp.ne.s32.totalorder %s554_s8, %s550_s7 }
   0x9   : > { %p55_p2 = scmp.eq.s32.totalorder %s566_s11, 0  ;;  %p60_p3 = scmp.ne.s32.totalorder %s550_s7, %s546_s6 }
   0xa   : > { %s731_s14 = smov (%p38_p0, %s36_s14), 0  ;;  %p61_p5 = scmp.eq.s32.totalorder %s374_s12, 0 }
   0xb   : > { %p619_p4 = por %p55_p2, %p54_p1  ;;  %s40_s17 = ssub.s32 %s562_s10, %s731_s14 }
   0xc   : > { %p86_p6 = scmp.eq.s32.totalorder %s374_s12, 1  ;;  %p45_p7 = scmp.eq.s32.totalorder %s40_s17, 0 }
   0xd   : > { %p625_p8 = por %p61_p5, %p60_p3  ;;  %p92_p10 = scmp.eq.s32.totalorder %s375_s13, 1 }
   0xe   : > { %p629_p9 = por %p86_p6, %p54_p1  ;;  %p377_p12 = scmp.ge.s32.totalorder %s566_s11, 2 }
   0xf   : > { %s634_s20 = scalar_select %p45_p7, %s554_s8, %s47_s15  }
  0x10   : > { %p636_p11 = por %p92_p10, %p60_p3  ;;  %p404_p13 = scmp.lt.s32.totalorder %s566_s11, 2 }
  0x11   : > { %s112_s22 = sand.u32 1, %s554_s8   ;;  %s390_s24 = sshll.u32 %s562_s10, 3 }
  0x12   : > { %s378_s23 = sshll.u32 %s112_s22, 3  ;;  %s125_s27 = scalar_lea.hbm %s717_s0, %s390_s24 }
  0x13   : > { %s116_s28 = scalar_lea.vmem [#allocation4], %s378_s23  ;;  %s127_s30 = sshll.u32 %s125_s27, 4  ;;  %s128_s30 = int_to_ptr.hbm [resolvable:$true] %s127_s30 }
  0x14   : > { %s129_s29 = sshll.u32 %s116_s28, 4  ;;  %p397_p0 = pnand %p404_p13, %p619_p4  ;;  %s130_s29 = int_to_ptr.vmem [resolvable:$true] %s129_s29 }
  0x15   : > { %p381_p1 = scmp.ge.s32.totalorder %s566_s11, 1  ;;  %p134_p2 = scmp.lt.s32.totalorder %s566_s11, 3 }
  0x16   : > { %s113_s2 = scalar_lea.sflag [#allocation5], %s112_s22 }
  0x17   : > { %399 = dma.hbm_to_vmem [thread:$0]  (!%p397_p0), %s128_s30, 128, %s130_s29, %s113_s2  }
  0x18   : > { %p135_p3 = pnand %p381_p1, %p134_p2 }
  0x19   : > { %s652_s3 = sand.u32 (!%p135_p3), 1, %s550_s7  }
  0x1a   : > { %138 = sbr.rel (%p135_p3) target bundleno = 78 (0x4e), region = 24  ;;  %s382_s4 = sshll.u32 (!%p135_p3), %s652_s3, 3 }
  0x1b   : > { %s141_s5 = scalar_lea.sflag (!%p135_p3), [#allocation5], %s652_s3  ;;  %s144_s12 = scalar_lea.vmem (!%p135_p3), [#allocation4], %s382_s4 }
  0x1f   : > { %537 = dma.done.wait (%p625_p8), %s141_s5, 128  }
  0x20   : > { %539 = vsyncadd (%p625_p8), %s141_s5, 4294967168  ;;  %v166_v0 = vld [vmem:[%s144_s12] sm:$0xff]  ;;  %vm173_vm0 = vcmask 1043456   ;;  %v217_v15 = vlaneseq  ;;  %vm214_vm1 = vcmask 1040384   ;;  %s383_s13 = sshll.u32 %s652_s3, 2  ;;  %s391_s15 = sshll.u32 %s558_s9, 2 }
  0x21   : > { %168 = vst [vmem:[#allocation1] ss:$2 sm:$0xff] %v166_v0  ;;  %s163_s16 = scalar_lea.vmem [#allocation7], %s383_s13  ;;  %s280_s22 = scalar_lea.hbm %s718_s1, %s391_s15 }
  0x22   : > { %vm664_vm2 = vcmp.lt.s32.totalorder %v217_v15, 256  ;;  %s282_s23 = sshll.u32 %s163_s16, 4  ;;  %s284_s24 = sshll.u32 %s280_s22, 4  ;;  %s283_s23 = int_to_ptr.vmem [resolvable:$true] %s282_s23  ;;  %s285_s24 = int_to_ptr.hbm [resolvable:$true] %s284_s24 }
  0x23   : > { %s267_s9 = scalar_lea.sflag [#allocation6], %s652_s3  ;;  %s498_s25 = sshra.s32 %s285_s24, 4  ;;  %s499_s25 = int_to_ptr.hbm [resolvable:$true] %s498_s25 }
  0x24   : > { %s500_s26 = scalar_lea.hbm %s499_s25, 4  ;;  %s504_s29 = scalar_lea.hbm %s718_s1, 8 }
  0x25   : > { %p501_p4 = scmp.ne.s32.totalorder %s499_s25, %s500_s26  ;;  %p505_p7 = scmp.lt.s32.totalorder %s499_s25, %s718_s1 }
  0x26   : > { %p506_p8 = scmp.lt.s32.totalorder %s504_s29, %s500_s26 }
  0x27   : > { %p502_p5 = pnand %p501_p4, %p629_p9 }
  0x28   : > { %v169_v1 = vld.sshfl [vmem:[#allocation1] sm:$0xff pattern:$0x75316420]  ;;  %v170_v2 = vld.sshfl [vmem:[#allocation1 + $0x8] sm:$0xff pattern:$0x75316420]  ;;  %p507_p10 = por %p506_p8, %p505_p7 }
  0x29   : > { %v174_v3 = vsel %vm173_vm0, %v169_v1, -inf  ;;  %v181_v4 = vsel %vm173_vm0, %v170_v2, -inf  ;;  %188 = vst [vmem:[#allocation1] ss:$2 sm:$0xff] %v166_v0  ;;  %p503_p6 = pneg %p502_p5 }
  0x2a   : > { %v175_v5 = vrot.slane %v174_v3, 4  ;;  %v182_v6 = vrot.slane %v181_v4, 4 }
  0x2b   : > { %p508_p13 = pnand %p507_p10, %p503_p6 }
  0x2c   : > { %v176_v7 = vmax.f32 %v174_v3, %v175_v5  ;;  %v183_v8 = vmax.f32 %v181_v4, %v182_v6 }
  0x2e   : > { %v177_v9 = vrot.slane %v176_v7, 2  ;;  %v184_v10 = vrot.slane %v183_v8, 2 }
  0x30   : > { %v178_v11 = vmax.f32 %v176_v7, %v177_v9  ;;  %v185_v12 = vmax.f32 %v183_v8, %v184_v10  ;;  %v189_v13 = vld.sshfl [vmem:[#allocation1] sm:$0xff pattern:$0x75316420]  ;;  %v190_v14 = vld.sshfl [vmem:[#allocation1 + $0x8] sm:$0xff pattern:$0x75316420] }
  0x31   : > { %v193_v16 = vsel %vm173_vm0, %v189_v13, 0.0  ;;  %v200_v17 = vsel %vm173_vm0, %v190_v14, 0.0 }
  0x32   : > { %v179_v18 = vrot.slane %v178_v11, 1  ;;  %v186_v19 = vrot.slane %v185_v12, 1  ;;  %v194_v20 = vrot.slane %v193_v16, 4  ;;  %v201_v21 = vrot.slane %v200_v17, 4 }
  0x34   : > { %v187_v22 = vmax.f32 %v185_v12, %v186_v19  ;;  %v195_v23 = vadd.f32 %v194_v20, %v193_v16  ;;  %v202_v24 = vadd.f32 %v201_v21, %v200_v17  ;;  %v180_v26 = vmax.f32 %v178_v11, %v179_v18 }
  0x36   : > { %v213_v27 = vrot.slane %v187_v22, 7  ;;  %v196_v28 = vrot.slane %v195_v23, 2  ;;  %v203_v29 = vrot.slane %v202_v24, 2 }
  0x38   : > { %v215_v30 = vsel %vm214_vm1, %v180_v26, %v213_v27  ;;  %v197_v31 = vadd.f32 %v196_v28, %v195_v23  ;;  %v204_v32 = vadd.f32 %v203_v29, %v202_v24 }
  0x39   : > { %221 = vst.msk [vmem:[#allocation2] sm:$0x3] %vm664_vm2, %v215_v30 }
  0x3a   : > { %v198_v33 = vrot.slane %v197_v31, 1  ;;  %v205_v34 = vrot.slane %v204_v32, 1 }
  0x3c   : > { %v206_v35 = vadd.f32 %v205_v34, %v204_v32  ;;  %v199_v36 = vadd.f32 %v198_v33, %v197_v31 }
  0x3e   : > { %v224_v37 = vrot.slane %v206_v35, 7 }
  0x40   : > { %v225_v38 = vsel %vm214_vm1, %v199_v36, %v224_v37  ;;  %v256_v39 = vld [vmem:[#allocation2] sm:$0x3] }
  0x41   : > { %227 = vst.msk [vmem:[#allocation3] sm:$0x3] %vm664_vm2, %v225_v38 }
  0x42   : > { %261 = vst.msk [vmem:[%s163_s16] ss:$2 sm:$0x3] %vm664_vm2, %v256_v39 }
  0x48   : > { %v262_v40 = vld [vmem:[#allocation3] sm:$0x3] }
  0x49   : > { %v263_v41 = vmul.f32 0.25, %v262_v40 }
  0x4b   : > { %384 = vst.msk [vmem:[%s163_s16 + $0x1] ss:$2 sm:$0x3] %vm664_vm2, %v263_v41 }
  0x4c   : > { %511 = shalt.err (!%p508_p13)
}
  0x4d   : > { %394 = dma.vmem_to_hbm [thread:$0]  (%p629_p9), %s283_s23, 64, %s285_s24, %s267_s9  }
  0x4e PF: > { %s296_s3 = sand.u32 1, %s546_s6   ;;  %p401_p0 = pnand %p377_p12, %p636_p11 }
  0x4f   : > { %s297_s4 = scalar_lea.sflag [#allocation6], %s296_s3 }
  0x50   : > { %p402_p1 = pneg %p401_p0 }
  0x52   : > { %541 = dma.done.wait (%p402_p1), %s297_s4, 64  }
  0x53   : > { %543 = vsyncadd (%p402_p1), %s297_s4, 4294967232  ;;  %s17_s11 = sadd.s32 1, %s566_s11   ;;  %s725_s6 = smov %s550_s7 }
  0x54   : > { %p14_p2 = scmp.ge.s32.totalorder %s17_s11, 4   ;;  %s726_s7 = smov %s554_s8 }
  0x55   : > { %s727_s8 = smov %s634_s20  ;;  %s728_s9 = smov %s562_s10 }
  0x56   : > { %s729_s10 = smov %s731_s14  ;;  %16 = sbr.rel (!%p14_p2) target bundleno = 6 (0x6), region = 82 }
  0x5b   :  { %303 = vsyncpa [#allocation5], 1 }
  0x5c   :  { %305 = vsyncpa [#allocation5 + $0x1], 1 }
  0x5d   :  { %306 = vsyncpa [#allocation6], 1 }
  0x5e   :  { %308 = vsyncpa [#allocation6 + $0x1], 1 }

</bundles_post_ra>
